<compile_context>
chip_gen: v5e
topology: v5e:2x2
jax: 0.10.0
libtpu: 0.0.40
codegen_flags: <defaults>
</compile_context>

<pallas_src>
import functools
import math

import jax
import jax.numpy as jnp
from jax.experimental import pallas as pl
from jax.experimental.pallas import tpu as pltpu


# ---------------------------------------------------------------------------
# Pallas kernel: 3x3 conv as three dy-grouped im2col matmuls per row tile.
# ---------------------------------------------------------------------------
def _conv3x3_dyslab_kernel(x_ref, w_ref, b_ref, o_ref, slab_ref, *, width, tile_hw):
    """Channel-first conv on a vertically pre-padded, spatially flattened image.

    x_ref:    (1, Cin, (H+2)*W)  padded image (resident across row tiles)
    w_ref:    (3, Cout, 3*Cin)   weights grouped by dy; columns ordered (dx, cin)
    b_ref:    (Cout, 1)          bias (broadcast over spatial lanes)
    o_ref:    (1, Cout, TH*W)    output row tile (lane-dense store)
    slab_ref: (3*Cin, (TH+2)*W)  VMEM scratch: dx-shifted window slab (per tile)
    """
    t = pl.program_id(1)
    cin = x_ref.shape[1]
    cout = o_ref.shape[1]
    win = tile_hw + 2 * width

    start = t * tile_hw
    if tile_hw % 128 == 0:
        start = pl.multiple_of(start, 128)
    xw = x_ref[0, :, pl.ds(start, win)]                       # (Cin, win)

    # dx lane masks from an in-kernel iota (no mask input / DMA).
    col = jax.lax.broadcasted_iota(jnp.int32, (1, win), 1) % width
    left = jnp.where(col >= 1, pltpu.roll(xw, shift=1, axis=1), 0)            # src col w-1
    right = jnp.where(col < width - 1, pltpu.roll(xw, shift=win - 1, axis=1), 0)  # src col w+1

    # Full-extent, lane-aligned slab stores (rows ordered dx-major, cin-minor).
    slab_ref[0 * cin:1 * cin, :] = left.astype(slab_ref.dtype)
    slab_ref[1 * cin:2 * cin, :] = xw.astype(slab_ref.dtype)
    slab_ref[2 * cin:3 * cin, :] = right.astype(slab_ref.dtype)

    # Three MXU matmuls with fp32 accumulation. The dy taps are just RHS slices
    # of the slab offset by dy*W (the padded zero rows realize the dy masking).
    acc = jnp.zeros((cout, tile_hw), jnp.float32)
    for dy in range(3):
        rhs = slab_ref[:, dy * width:dy * width + tile_hw]
        acc = acc + jnp.dot(w_ref[dy], rhs, preferred_element_type=jnp.float32)
    acc = acc + b_ref[...].astype(jnp.float32)
    o_ref[0] = acc.astype(o_ref.dtype)


# ---------------------------------------------------------------------------
# Wrapper helpers.
# ---------------------------------------------------------------------------
def _tpu_vmem_capacity_bytes():
    try:
        return int(pltpu.get_tpu_info().vmem_capacity_bytes)
    except Exception:
        return 64 * 1024 * 1024   # conservative (v7x per-TC) fallback


def _pick_row_tile(height, width, cin, cout, itemsize, budget_bytes):
    """Largest row tile TH dividing H whose TH*W is a multiple of 128 (or the
    full image) and whose output double-buffer + slab scratch fit the VMEM
    budget, preferring >= 2 tiles so output writeback pipelines / shards."""
    divisors = [d for d in range(height, 0, -1) if height % d == 0]
    aligned = [d for d in divisors if (d * width) % 128 == 0]

    fixed = (2 * cin * (height + 2) * width       # double-buffered resident input
             + 2 * 3 * cout * 3 * cin             # weights
             + 2 * cout) * itemsize               # bias
    avail = max(budget_bytes - fixed, 0)

    def variable_cost(th):
        thw = th * width
        return (2 * cout * thw + 3 * cin * (thw + 2 * width)) * itemsize

    fitting = [d for d in aligned if variable_cost(d) <= avail]
    for d in fitting:                              # largest with >=2 decent tiles
        if height // d >= 2 and d * width >= 256:
            return d
    for d in fitting:                              # largest with >=2 tiles
        if height // d >= 2:
            return d
    if fitting:
        return fitting[0]
    if aligned:
        return aligned[-1]
    # No 128-aligned row tiling exists: fall back to the full image, which is a
    # legal full-extent block (may use masked stores but never mis-tiles).
    return height


def conv3x3_chw(x_pad_flat, w3, b2, *, height, width):
    """Conv2d(k=3, s=1, p=1), channel-first. Input is vertically pre-padded.

    x_pad_flat: (N, Cin, (H+2)*W),  w3: (3, Cout, 3*Cin),  b2: (Cout, 1)
    returns (N, Cout, H*W)
    """
    n, cin, hwp = x_pad_flat.shape
    assert hwp == (height + 2) * width
    cout = w3.shape[1]
    itemsize = jnp.dtype(x_pad_flat.dtype).itemsize

    vmem_cap = _tpu_vmem_capacity_bytes()
    th = _pick_row_tile(height, width, cin, cout, itemsize, vmem_cap // 2)
    thw = th * width
    num_tiles = height // th

    kernel = functools.partial(_conv3x3_dyslab_kernel, width=width, tile_hw=thw)
    return pl.pallas_call(
        kernel,
        out_shape=jax.ShapeDtypeStruct((n, cout, height * width), x_pad_flat.dtype),
        grid=(n, num_tiles),
        in_specs=[
            pl.BlockSpec((1, cin, hwp), lambda i, t: (i, 0, 0)),   # image, resident over t
            pl.BlockSpec((3, cout, 3 * cin), lambda i, t: (0, 0, 0)),
            pl.BlockSpec((cout, 1), lambda i, t: (0, 0)),
        ],
        out_specs=pl.BlockSpec((1, cout, thw), lambda i, t: (i, 0, t)),
        scratch_shapes=[pltpu.VMEM((3 * cin, thw + 2 * width), x_pad_flat.dtype)],
        compiler_params=pltpu.CompilerParams(
            dimension_semantics=("parallel", "parallel"),
            vmem_limit_bytes=min(int(vmem_cap * 0.75), 100 * 1024 * 1024)),
    )(x_pad_flat, w3, b2)


# ---------------------------------------------------------------------------
# PixelShuffle (channel-first) — pure data movement, one XLA transpose.
# ---------------------------------------------------------------------------
def pixel_shuffle_nchw(y_flat, height, width, r):
    """torch.nn.PixelShuffle on a channel-first, spatially-flattened tensor."""
    n, crr, _ = y_flat.shape
    c = crr // (r * r)
    y = y_flat.reshape(n, c, r, r, height, width)
    y = jnp.transpose(y, (0, 1, 4, 2, 5, 3))        # (N, C, H, r, W, r)
    return y.reshape(n, c, height * r, width * r)


# ---------------------------------------------------------------------------
# Upsample module equivalent.
# ---------------------------------------------------------------------------
def make_upsample_params(key, scale, num_feat, dtype=jnp.float32):
    """Deterministic synthetic parameters mirroring nn.Conv2d(num_feat, r*r*num_feat, 3)."""
    if scale & (scale - 1) == 0:
        stages = [(2, 4 * num_feat) for _ in range(int(math.log2(scale)))]
    elif scale == 3:
        stages = [(3, 9 * num_feat)]
    else:
        raise ValueError(
            f"scale {scale} is not supported. Supported scales: 2^n and 3.")

    params = []
    bound = 1.0 / math.sqrt(num_feat * 3 * 3)
    for r, cout in stages:
        key, kw, kb = jax.random.split(key, 3)
        w = jax.random.uniform(kw, (cout, num_feat, 3, 3), dtype,
                               minval=-bound, maxval=bound)   # PyTorch OIHW layout
        b = jax.random.uniform(kb, (cout,), dtype, minval=-bound, maxval=bound)
        # dy-grouped im2col weight: w3[dy, cout, dx*cin + ci] = w[cout, ci, dy, dx]
        w3 = jnp.transpose(w, (2, 0, 3, 1)).reshape(3, cout, 3 * num_feat)
        params.append({"r": r, "w": w, "b": b, "w3": w3, "b2": b.reshape(cout, 1)})
    return params


def upsample_forward(params, x_nchw):
    """Forward pass matching Upsample.forward (NCHW in/out, channel-first native)."""
    n, c, h, w = x_nchw.shape
    x = x_nchw
    for p in params:
        r = p["r"]
        # One zero row above/below realizes the dy padding (no dy masks in-kernel).
        xp = jnp.pad(x, ((0, 0), (0, 0), (1, 1), (0, 0)))
        xp = xp.reshape(n, c, (h + 2) * w)
        y = conv3x3_chw(xp, p["w3"], p["b2"], height=h, width=w)   # (N, Cout, H*W)
        x = pixel_shuffle_nchw(y, h, w, r)                          # (N, C, H*r, W*r)
        h, w = h * r, w * r
    return x


def upsample_reference(params, x_nchw):
    """Pure-JAX/XLA reference (conv + pixel shuffle) for numerical validation."""
    x = x_nchw
    for p in params:
        y = jax.lax.conv_general_dilated(
            x, p["w"], window_strides=(1, 1), padding=((1, 1), (1, 1)),
            dimension_numbers=("NCHW", "OIHW", "NCHW"),
            precision=jax.lax.Precision.HIGHEST)
        y = y + p["b"].reshape(1, -1, 1, 1)
        r = p["r"]
        nb, crr, hh, ww = y.shape
        c = crr // (r * r)
        y = y.reshape(nb, c, r, r, hh, ww)
        x = jnp.transpose(y, (0, 1, 4, 2, 5, 3)).reshape(nb, c, hh * r, ww * r)
    return x


if __name__ == "__main__":
    scale = 4          # -> two (conv + PixelShuffle(2)) stages
    num_feat = 4
    N, H, W = 2, 16, 16

    key = jax.random.PRNGKey(0)
    key, kx = jax.random.split(key)
    x = jax.random.normal(kx, (N, num_feat, H, W), jnp.float32)   # NCHW like PyTorch

    params = make_upsample_params(key, scale, num_feat)

    out = upsample_forward(params, x)
    out = jax.block_until_ready(out)

    assert out.shape == (N, num_feat, H * scale, W * scale), out.shape
    assert out.dtype == x.dtype

    ref = upsample_reference(params, x)
    err = float(jnp.max(jnp.abs(out - ref)))
    assert err < 5e-3, f"max abs error vs reference: {err}"

    print("KERNEL_OK")
</pallas_src>

<mosaic_0001>
module attributes {stable_mosaic.version = 11 : i64} {
  func.func @_conv3x3_dyslab_kernel(%arg0: i32, %arg1: i32, %arg2: memref<1x4x288xf32, #tpu.memory_space<vmem>>, %arg3: memref<3x16x12xf32, #tpu.memory_space<vmem>>, %arg4: memref<16x1xf32, #tpu.memory_space<vmem>>, %arg5: memref<1x16x128xf32, #tpu.memory_space<vmem>>, %arg6: memref<12x160xf32, #tpu.memory_space<vmem>>) attributes {dimension_semantics = [#tpu.dimension_semantics<parallel>, #tpu.dimension_semantics<parallel>], iteration_bounds = array<i64: 2, 2>, scalar_prefetch = 0 : i64, scratch_operands = 1 : i64, tpu.core_type = #tpu.core_type<tc>, window_params = [{transform_indices = @transform_0, window_bounds = array<i64: 1, 4, 288>}, {pipeline_mode = #tpu.pipeline_mode<synchronous>, transform_indices = @transform_1, window_bounds = array<i64: 3, 16, 12>}, {pipeline_mode = #tpu.pipeline_mode<synchronous>, transform_indices = @transform_2, window_bounds = array<i64: 16, 1>}, {transform_indices = @transform_3, window_bounds = array<i64: 1, 16, 128>}]} {
    %c128_i32 = arith.constant 128 : i32
    %0 = arith.muli %arg1, %c128_i32 : i32
    %1 = tpu.assume_multiple %0, 128 : i32
    %c0 = arith.constant 0 : index
    %c0_0 = arith.constant 0 : index
    %2 = arith.index_cast %1 : i32 to index
    %3 = vector.load %arg2[%c0, %c0_0, %2] : memref<1x4x288xf32, #tpu.memory_space<vmem>>, vector<1x4x160xf32>
    %4 = vector.shape_cast %3 : vector<1x4x160xf32> to vector<4x160xf32>
    %5 = tpu.iota {dimensions = array<i32: 1>} : vector<1x160xi32>
    %c16_i32 = arith.constant 16 : i32
    %c0_i32 = arith.constant 0 : i32
    %6 = arith.cmpi eq, %c16_i32, %c0_i32 : i32
    %c1_i32 = arith.constant 1 : i32
    %7 = arith.select %6, %c1_i32, %c16_i32 : i32
    %8 = vector.broadcast %7 : i32 to vector<1x160xi32>
    %9 = arith.remsi %5, %8 : vector<1x160xi32>
    %c0_i32_1 = arith.constant 0 : i32
    %10 = vector.broadcast %c0_i32_1 : i32 to vector<1x160xi32>
    %11 = arith.cmpi ne, %9, %10 : vector<1x160xi32>
    %c0_i32_2 = arith.constant 0 : i32
    %12 = vector.broadcast %c0_i32_2 : i32 to vector<1x160xi32>
    %13 = arith.cmpi slt, %9, %12 : vector<1x160xi32>
    %c0_i32_3 = arith.constant 0 : i32
    %14 = arith.cmpi slt, %7, %c0_i32_3 : i32
    %15 = vector.broadcast %14 : i1 to vector<1x160xi1>
    %16 = vector.broadcast %15 : vector<1x160xi1> to vector<1x160xi1>
    %17 = arith.xori %13, %16 : vector<1x160xi1>
    %18 = arith.andi %17, %11 : vector<1x160xi1>
    %19 = vector.broadcast %7 : i32 to vector<1x160xi32>
    %20 = arith.addi %9, %19 : vector<1x160xi32>
    %21 = arith.select %18, %20, %9 : vector<1x160xi1>, vector<1x160xi32>
    %c1_i32_4 = arith.constant 1 : i32
    %22 = vector.broadcast %c1_i32_4 : i32 to vector<1x160xi32>
    %23 = arith.cmpi sge, %21, %22 : vector<1x160xi32>
    %c1_i32_5 = arith.constant 1 : i32
    %24 = tpu.dynamic_rotate %4 by %c1_i32_5 dim 1 : vector<4x160xf32>, i32 -> vector<4x160xf32>
    %c0_i32_6 = arith.constant 0 : i32
    %25 = arith.sitofp %c0_i32_6 : i32 to f32
    %26 = vector.shape_cast %23 : vector<1x160xi1> to vector<1x160xi1>
    %27 = vector.broadcast %26 : vector<1x160xi1> to vector<4x160xi1>
    %28 = vector.broadcast %25 : f32 to vector<4x160xf32>
    %29 = arith.select %27, %24, %28 : vector<4x160xi1>, vector<4x160xf32>
    %c15_i32 = arith.constant 15 : i32
    %30 = vector.broadcast %c15_i32 : i32 to vector<1x160xi32>
    %31 = arith.cmpi slt, %21, %30 : vector<1x160xi32>
    %c159_i32 = arith.constant 159 : i32
    %32 = tpu.dynamic_rotate %4 by %c159_i32 dim 1 : vector<4x160xf32>, i32 -> vector<4x160xf32>
    %c0_i32_7 = arith.constant 0 : i32
    %33 = arith.sitofp %c0_i32_7 : i32 to f32
    %34 = vector.shape_cast %31 : vector<1x160xi1> to vector<1x160xi1>
    %35 = vector.broadcast %34 : vector<1x160xi1> to vector<4x160xi1>
    %36 = vector.broadcast %33 : f32 to vector<4x160xf32>
    %37 = arith.select %35, %32, %36 : vector<4x160xi1>, vector<4x160xf32>
    %c0_8 = arith.constant 0 : index
    %c0_9 = arith.constant 0 : index
    %38 = vector.load %arg6[%c0_8, %c0_9] : memref<12x160xf32, #tpu.memory_space<vmem>>, vector<4x160xf32>
    tpu.vector_store %arg6[%c0_8, %c0_9], %29 {strides = array<i32>} : memref<12x160xf32, #tpu.memory_space<vmem>>, vector<4x160xf32>,
    %c4 = arith.constant 4 : index
    %c0_10 = arith.constant 0 : index
    %39 = vector.load %arg6[%c4, %c0_10] : memref<12x160xf32, #tpu.memory_space<vmem>>, vector<4x160xf32>
    tpu.vector_store %arg6[%c4, %c0_10], %4 {strides = array<i32>} : memref<12x160xf32, #tpu.memory_space<vmem>>, vector<4x160xf32>,
    %c8 = arith.constant 8 : index
    %c0_11 = arith.constant 0 : index
    %40 = vector.load %arg6[%c8, %c0_11] : memref<12x160xf32, #tpu.memory_space<vmem>>, vector<4x160xf32>
    tpu.vector_store %arg6[%c8, %c0_11], %37 {strides = array<i32>} : memref<12x160xf32, #tpu.memory_space<vmem>>, vector<4x160xf32>,
    %cst = arith.constant 0.000000e+00 : f32
    %41 = vector.broadcast %cst : f32 to vector<16x128xf32>
    %c0_12 = arith.constant 0 : index
    %c0_13 = arith.constant 0 : index
    %42 = vector.load %arg6[%c0_12, %c0_13] : memref<12x160xf32, #tpu.memory_space<vmem>>, vector<12x128xf32>
    %c0_14 = arith.constant 0 : index
    %c0_15 = arith.constant 0 : index
    %c0_16 = arith.constant 0 : index
    %43 = vector.load %arg3[%c0_14, %c0_15, %c0_16] : memref<3x16x12xf32, #tpu.memory_space<vmem>>, vector<1x16x12xf32>
    %44 = vector.shape_cast %43 : vector<1x16x12xf32> to vector<16x12xf32>
    %cst_17 = arith.constant dense<0.000000e+00> : vector<16x128xf32>
    %45 = tpu.matmul %44, %42, %cst_17 {dimension_numbers = #tpu.dot_dimension_numbers<[1], [0], [0], [1], [0, 0, 1, 1], [], []>} : vector<16x12xf32>, vector<12x128xf32>, vector<16x128xf32> -> vector<16x128xf32>
    %46 = arith.addf %41, %45 : vector<16x128xf32>
    %c0_18 = arith.constant 0 : index
    %c16 = arith.constant 16 : index
    %47 = vector.load %arg6[%c0_18, %c16] : memref<12x160xf32, #tpu.memory_space<vmem>>, vector<12x128xf32>
    %c1 = arith.constant 1 : index
    %c0_19 = arith.constant 0 : index
    %c0_20 = arith.constant 0 : index
    %48 = vector.load %arg3[%c1, %c0_19, %c0_20] : memref<3x16x12xf32, #tpu.memory_space<vmem>>, vector<1x16x12xf32>
    %49 = vector.shape_cast %48 : vector<1x16x12xf32> to vector<16x12xf32>
    %cst_21 = arith.constant dense<0.000000e+00> : vector<16x128xf32>
    %50 = tpu.matmul %49, %47, %cst_21 {dimension_numbers = #tpu.dot_dimension_numbers<[1], [0], [0], [1], [0, 0, 1, 1], [], []>} : vector<16x12xf32>, vector<12x128xf32>, vector<16x128xf32> -> vector<16x128xf32>
    %51 = arith.addf %46, %50 : vector<16x128xf32>
    %c0_22 = arith.constant 0 : index
    %c32 = arith.constant 32 : index
    %52 = vector.load %arg6[%c0_22, %c32] : memref<12x160xf32, #tpu.memory_space<vmem>>, vector<12x128xf32>
    %c2 = arith.constant 2 : index
    %c0_23 = arith.constant 0 : index
    %c0_24 = arith.constant 0 : index
    %53 = vector.load %arg3[%c2, %c0_23, %c0_24] : memref<3x16x12xf32, #tpu.memory_space<vmem>>, vector<1x16x12xf32>
    %54 = vector.shape_cast %53 : vector<1x16x12xf32> to vector<16x12xf32>
    %cst_25 = arith.constant dense<0.000000e+00> : vector<16x128xf32>
    %55 = tpu.matmul %54, %52, %cst_25 {dimension_numbers = #tpu.dot_dimension_numbers<[1], [0], [0], [1], [0, 0, 1, 1], [], []>} : vector<16x12xf32>, vector<12x128xf32>, vector<16x128xf32> -> vector<16x128xf32>
    %56 = arith.addf %51, %55 : vector<16x128xf32>
    %c0_26 = arith.constant 0 : index
    %c0_27 = arith.constant 0 : index
    %57 = vector.load %arg4[%c0_26, %c0_27] : memref<16x1xf32, #tpu.memory_space<vmem>>, vector<16x1xf32>
    %58 = vector.broadcast %57 : vector<16x1xf32> to vector<16x128xf32>
    %59 = arith.addf %56, %58 : vector<16x128xf32>
    %c0_28 = arith.constant 0 : index
    %c0_29 = arith.constant 0 : index
    %c0_30 = arith.constant 0 : index
    %60 = vector.load %arg5[%c0_28, %c0_29, %c0_30] : memref<1x16x128xf32, #tpu.memory_space<vmem>>, vector<1x16x128xf32>
    %61 = vector.shape_cast %60 : vector<1x16x128xf32> to vector<16x128xf32>
    %62 = vector.shape_cast %59 : vector<16x128xf32> to vector<1x16x128xf32>
    tpu.vector_store %arg5[%c0_28, %c0_29, %c0_30], %62 {strides = array<i32>} : memref<1x16x128xf32, #tpu.memory_space<vmem>>, vector<1x16x128xf32>,
    return
  }
  func.func @transform_0(%arg0: i32, %arg1: i32) -> (i32, i32, i32) {
    %c0_i32 = arith.constant 0 : i32
    %c0_i32_0 = arith.constant 0 : i32
    %c0_i32_1 = arith.constant 0 : i32
    return %arg0, %c0_i32, %c0_i32_0 : i32, i32, i32
  }
  func.func @transform_1(%arg0: i32, %arg1: i32) -> (i32, i32, i32) {
    %c0_i32 = arith.constant 0 : i32
    %c0_i32_0 = arith.constant 0 : i32
    %c0_i32_1 = arith.constant 0 : i32
    %c0_i32_2 = arith.constant 0 : i32
    return %c0_i32, %c0_i32_0, %c0_i32_1 : i32, i32, i32
  }
  func.func @transform_2(%arg0: i32, %arg1: i32) -> (i32, i32) {
    %c0_i32 = arith.constant 0 : i32
    %c0_i32_0 = arith.constant 0 : i32
    %c0_i32_1 = arith.constant 0 : i32
    return %c0_i32, %c0_i32_0 : i32, i32
  }
  func.func @transform_3(%arg0: i32, %arg1: i32) -> (i32, i32, i32) {
    %c0_i32 = arith.constant 0 : i32
    %c0_i32_0 = arith.constant 0 : i32
    return %arg0, %c0_i32, %arg1 : i32, i32, i32
  }
}

</mosaic_0001>

<bundles_post_ra>
// kernel: tpu_custom_call.1
= control target key start
LH: loop header
LB: loop body
LE: loop exit
PB: predicated region body
PF: predicated region fallthrough
CT: control target
= control target key end

     0   :  { %s1202_s0 = inlined_call_operand.hbm [shape: f32[2,4,288], index: 0, kind: input, shape index: {}]   ;;  %s1203_s1 = inlined_call_operand.hbm [shape: f32[3,16,12], index: 1, kind: input, shape index: {}]   ;;  %s1204_s2 = inlined_call_operand.vmem [shape: f32[16,1], index: 2, kind: input, shape index: {}]   ;;  %s1205_s3 = inlined_call_operand.hbm [shape: f32[2,16,256], index: 3, kind: output, shape index: {}]  }
   0x1   :  { %1215 = sst [smem:[#allocation19_spill]] %s1203_s1 }
   0x2   :  { %8 = vsyncpa [#allocation4], 0 }
   0x3   :  { %10 = vsyncpa [#allocation4 + $0x1], 0 }
   0x4   :  { %11 = vsyncpa [#allocation7], 0 }
   0x5   :  { %12 = vsyncpa [#allocation5], 0 }
   0x6   :  { %14 = vsyncpa [#allocation5 + $0x1], 0  ;;  %s978_s12 = smov 0   ;;  %s980_s13 = smov 0  }
   0x7   :  { %s982_s14 = smov 0   ;;  %s984_s15 = smov 0  }
   0x8   :  { %s986_s16 = smov 0   ;;  %s988_s17 = smov 0  }
   0x9   :  { %s990_s18 = smov 0   ;;  %s992_s19 = smov 0  }
   0xa   :  { %s994_s20 = smov 0   ;;  %s996_s21 = smov 0  }
   0xb   :  { %s998_s22 = smov 0  }
   0xc LB: > { %1216 = sst [smem:[#allocation12_spill]] %s904_s12  ;;  %s591_s23 = sadd.s32 4294967295, %s944_s22   ;;  %s944_s22 = sphi %s998_s22, %s20_s22   ;;  %s940_s21 = sphi %s996_s21, %s1246_s21   ;;  %s936_s20 = sphi %s994_s20, %s1245_s20   ;;  %s932_s19 = sphi %s992_s19, %s1244_s19   ;;  %s928_s18 = sphi %s990_s18, %s1235_s18   ;;  %s924_s17 = sphi %s988_s17, %s1243_s17   ;;  %s920_s16 = sphi %s986_s16, %s1242_s16   ;;  %s916_s15 = sphi %s984_s15, %s1241_s15   ;;  %s912_s14 = sphi %s982_s14, %s1240_s14   ;;  %s908_s13 = sphi %s980_s13, %s1239_s13   ;;  %s904_s12 = sphi %s978_s12, %s1238_s12  }
   0xd   : > { %1217 = sst [smem:[#allocation13_spill]] %s936_s20  ;;  %s592_s24 = sadd.s32 4294967294, %s944_s22  }
   0xe   : > { %1218 = sst [smem:[#allocation14_spill]] %s944_s22  ;;  %p1035_p0 = scmp.eq.s32.totalorder %s591_s23, 0 }
   0xf   : > { %p119_p1 = scmp.ne.s32.totalorder %s912_s14, %s908_s13  ;;  %p120_p2 = scmp.eq.s32.totalorder %s591_s23, 3 }
  0x10   : > { %p125_p3 = scmp.ne.s32.totalorder %s908_s13, %s904_s12  ;;  %p126_p4 = scmp.eq.s32.totalorder %s592_s24, 3 }
  0x11   : > { %p593_p5 = scmp.ge.s32.totalorder %s944_s22, 1  ;;  %p1044_p6 = por %p120_p2, %p119_p1 }
  0x12   : > { %p133_p7 = scmp.lt.s32.totalorder %s944_s22, 5  ;;  %p1049_p8 = por %p126_p4, %p125_p3 }
  0x13   : > { %s1220_s26 = scalar_select %p1044_p6, 1, 0 }
  0x14   : > { %s1222_s27 = scalar_select %p1049_p8, 1, 0 }
  0x15   : > { %1221 = sst [smem:[#allocation15_spill]] %s1220_s26  ;;  %p1053_p9 = pnand %p593_p5, %p133_p7 }
  0x16   : > { %1223 = sst [smem:[#allocation16_spill]] %s1222_s27  ;;  %s946_s5 = smov [#allocation6]  }
  0x17   : > { %s1225_s1 = sld [smem:[#allocation19_spill]]  ;;  %p629_p10 = pneg %p1053_p9 }
  0x18   : > { %s146_s6 = sshll.u32 %s946_s5, 4  ;;  %s947_s7 = smov 128   ;;  %s147_s6 = int_to_ptr.vmem [resolvable:$true] %s146_s6 }
  0x19   : > { %p630_p11 = pnand %p629_p10, %p1035_p0  ;;  %s948_s8 = smov 8  }
  0x1a   : > { %s29_s9 = sadd.s32 1, %s936_s20  ;;  %s32_s10 = sadd.s32 1, %s940_s21 }
  0x1b   : > { %p30_p12 = scmp.ge.s32.totalorder %s29_s9, 2  ;;  %s39_s11 = sadd.s32 1, %s924_s17 }
  0x1c   : > { %p46_p13 = scmp.ne.s32.totalorder %s924_s17, %s920_s16  ;;  %p47_p1 = scmp.eq.s32.totalorder %s944_s22, 0 }
  0x1d   : > { %s144_s4 = sshll.u32 %s1225_s1, 4  ;;  %s1248_s9 = smov (%p30_p12, %s29_s9), 0  ;;  %s145_s4 = int_to_ptr.hbm [resolvable:$true] %s144_s4 }
  0x1e   : > { %632 = dma.hbm_to_vmem [thread:$0]  (!%p630_p11), %s145_s4, 768, %s147_s6, [#allocation7], %s947_s7, %s947_s7, %s948_s8  }
  0x1f   : > { %1226 = sst [smem:[#allocation17_spill]] %s1248_s9  ;;  %s1250_s10 = smov (!%p30_p12, %s32_s10), %s940_s21 }
  0x20   : > { %p1073_p2 = por %p47_p1, %p46_p13  ;;  %p52_p3 = scmp.ne.s32.totalorder %s920_s16, %s916_s15 }
  0x21   : > { %p34_p4 = scmp.ge.s32.totalorder %s1250_s10, 2  ;;  %s105_s24 = ssub.s32 %s936_s20, %s1248_s9 }
  0x22   : > { %p1083_p5 = por %p1035_p0, %p52_p3  ;;  %s109_s30 = sadd.s32 1, %s912_s14 }
  0x23   : > { %s1252_s10 = smov (%p34_p4, %s1250_s10), 0  ;;  %p642_p7 = scmp.lt.s32.totalorder %s944_s22, 4 }
  0x24   : > { %1229 = sst [smem:[#allocation18_spill]] %s1252_s10  ;;  %s163_s4 = sand.u32 1, %s924_s17  }
  0x25   : > { %s36_s5 = ssub.s32 %s940_s21, %s1252_s10  ;;  %s618_s7 = smul.u32 12, %s163_s4 }
  0x26   : > { %p37_p10 = scmp.eq.s32.totalorder %s36_s5, 0  ;;  %s106_s6 = sor.u32 %s105_s24, %s36_s5 }
  0x27   : > { %p107_p11 = scmp.eq.s32.totalorder %s106_s6, 0  ;;  %s619_s1 = smul.u32 12, %s940_s21 }
  0x28   : > { %s1095_s15 = scalar_select %p37_p10, %s924_s17, %s39_s11  }
  0x29   : > { %s1098_s8 = scalar_select %p107_p11, %s912_s14, %s109_s30  }
  0x2a   : > { %s167_s9 = scalar_lea.vmem [#allocation3], %s618_s7  ;;  %p634_p12 = pnand %p642_p7, %p1073_p2 }
  0x2b   : > { %s176_s20 = sshll.u32 %s167_s9, 4  ;;  %s172_s26 = scalar_lea.hbm %s1202_s0, %s619_s1  ;;  %s177_s20 = int_to_ptr.vmem [resolvable:$true] %s176_s20 }
  0x2c   : > { %s174_s22 = sshll.u32 %s172_s26, 4  ;;  %s164_s10 = scalar_lea.sflag [#allocation4], %s163_s4  ;;  %s175_s22 = int_to_ptr.hbm [resolvable:$true] %s174_s22 }
  0x2d   : > { %636 = dma.hbm_to_vmem [thread:$0]  (!%p634_p12), %s175_s22, 192, %s177_s20, %s164_s10  }
  0x2e   : > { %185 = sbr.rel (%p1053_p9) target bundleno = 696 (0x2b8), region = 32  ;;  %s187_s11 = sand.u32 (!%p1053_p9), 1, %s920_s16  }
  0x2f   : > { %s620_s24 = smul.u32 (!%p1053_p9), 12, %s187_s11  ;;  %s188_s30 = scalar_lea.sflag (!%p1053_p9), [#allocation4], %s187_s11 }
  0x31   : > { %s191_s9 = scalar_lea.vmem (!%p1053_p9), [#allocation3], %s620_s24 }
  0x33   : > { %891 = dma.done.wait (%p1083_p5), %s188_s30, 192  }
  0x34   : > { %893 = vsyncadd (%p1083_p5), %s188_s30, 4294967104 }
  0x35   : > { %895 = dma.done.wait (%p1035_p0), [#allocation7], 768  }
  0x36   : > { %897 = vsyncadd (%p1035_p0), [#allocation7], 4294966528  ;;  %s600_s1 = sshll.u32 %s928_s18, 7  ;;  %s949_s26 = smov 32   ;;  %vm261_vm0 = vcmask 1047808   ;;  %v226_v9 = vlaneseq  ;;  %vm310_vm2 = vcmask 257024  }
  0x37   : > { %s221_s12 = sshra.s32 %s600_s1, 7  ;;  %s950_s25 = smov 127   ;;  %vm303_vm3 = vcmask 1039360   ;;  %vm319_vm5 = vcmask 261124   ;;  %vm355_vm6 = vcmask 1043456   ;;  %vm278_vm8 = vcmask 793600  }
  0x38   : > { %s601_s20 = sshll.u32 %s221_s12, 2  ;;  %s951_s27 = smov 97   ;;  %v227_v10 = vand.u32 127, %v226_v9  ;;  %vm423_vm10 = vcmask 785408   ;;  %vm344_vm11 = vcmask 916480   ;;  %vm348_vm12 = vcmask 97280  }
  0x39   : > { %s224_s22 = scalar_lea.vmem %s191_s9, %s601_s20 [#allocation3]  ;;  %s952_s28 = smov 96   ;;  %v325_v39 = vld [vmem:[#allocation6] sm:$0xff]  ;;  %v461_v41 = vld [vmem:[%s1204_s2 + $0x8] sm:$0xff]  ;;  %v954_v43 = vmov 0   ;;  %v330_v52 = vld [vmem:[#allocation6 + $0x10] sm:$0xff] }
  0x3a   : > { %v225_v0 = vld [vmem:[%s224_s22] sm:$0xff]  ;;  %v228_v11 = vadd.s32 128, %v227_v10  ;;  %v233_v18 = vand.u32 15, %v227_v10  ;;  %s953_s10 = smov 112   ;;  %v326_v42 = vld [vmem:[#allocation6 + $0x8] sm:$0xff]  ;;  %755 = vset.pattern.permute.xlu1 %v954_v43  ;;  %756 = vset.pattern.permute.xlu2 %v954_v43  ;;  %v331_v53 = vld [vmem:[#allocation6 + $0x18] sm:$0xff] }
  0x3b   : > { %256 = vst [vmem:[#allocation1] ss:$2 sm:$0xff] %v225_v0  ;;  %v460_v40 = vld [vmem:[%s1204_s2] sm:$0xff]  ;;  %757 = vset.pattern.permute.xlu0 %v954_v43  ;;  %v414_v55 = vld [vmem:[#allocation6 + $0x28] sm:$0xff]  ;;  %s612_s6 = sshll.u32 %s932_s19, 2  ;;  %s217_s7 = sand.u32 1, %s908_s13  }
  0x3c   : > { %v240_v12 = vand.u32 15, %v228_v11  ;;  %vm284_vm4 = vcmp.lt.s32.totalorder %v233_v18, 15  ;;  %vm253_vm9 = vcmp.ge.s32.totalorder %v233_v18, 1  ;;  %v413_v47 = vld [vmem:[#allocation6 + $0x20] sm:$0xff]  ;;  %s487_s11 = sadd.s32 %s928_s18, %s612_s6  ;;  %s599_s24 = sshll.u32 %s217_s7, 4 }
  0x3d   : > { %s613_s30 = sshll.u32 %s487_s11, 3  ;;  %s219_s20 = scalar_lea.vmem [#allocation8], %s599_s24 }
  0x3e   : > { %vm285_vm1 = vcmp.lt.s32.totalorder %v240_v12, 15  ;;  %vm254_vm7 = vcmp.ge.s32.totalorder %v240_v12, 1  ;;  %s489_s12 = scalar_lea.hbm %s1205_s3, %s613_s30  ;;  %s490_s22 = sshll.u32 %s219_s20, 4  ;;  %s491_s22 = int_to_ptr.vmem [resolvable:$true] %s490_s22 }
  0x3f   : > { %s492_s18 = sshll.u32 %s489_s12, 4  ;;  %s477_s19 = scalar_lea.sflag [#allocation5], %s217_s7  ;;  %s493_s18 = int_to_ptr.hbm [resolvable:$true] %s492_s18 }
  0x40   : > { %s838_s23 = scalar_lea.hbm %s1205_s3, 64 }
  0x42   : > { %v257_v1 = vld.sshfl [vmem:[#allocation1] sm:$0xff pattern:$0x75316420]  ;;  %v258_v2 = vld.sshfl [vmem:[#allocation1 + $0x8] sm:$0xff pattern:$0x75316420] }
  0x43   : > { %262 = vrot.lane.b32.xlu0 %v257_v1, %s949_s26  ;;  %286 = vst [vmem:[#allocation1] ss:$2 sm:$0xff] %v225_v0 }
  0x4a   : > { %v287_v3 = vld.sshfl [vmem:[#allocation1] sm:$0xff pattern:$0x75316420]  ;;  %v288_v4 = vld.sshfl [vmem:[#allocation1 + $0x8] sm:$0xff pattern:$0x75316420] }
  0x4b   : > { %291 = vrot.lane.b32.xlu0 %v287_v3, %s949_s26  ;;  %313 = vst [vmem:[#allocation1 + $0x1] ss:$2 sm:$0xff] %v225_v0 }
  0x52   : > { %v315_v23 = vld.sshfl [vmem:[#allocation1 + $0x8] sm:$0xff pattern:$0x75316420]  ;;  %v314_v24 = vld.sshfl [vmem:[#allocation1] sm:$0xff pattern:$0x75316420] }
  0x53   : > { %320 = vst.msk [vmem:[#allocation2 + $0x8] sm:$0xf0] %vm319_vm5, %v315_v23 }
  0x54   : > { %318 = vst [vmem:[#allocation2] sm:$0xf0] %v314_v24 }
  0xb5   : > { %v263_v5 = vpop.permute.xlu0 %262 }
  0xb6   : > { %v264_v6 = vsel %vm261_vm0, %v263_v5, %v258_v2 }
  0xb7   : > { %265 = vrot.lane.b32.xlu1 %v264_v6, %s949_s26 }
  0xbd   : > { %v292_v7 = vpop.permute.xlu0 %291 }
  0xbe   : > { %v293_v8 = vsel %vm261_vm0, %v292_v7, %v288_v4 }
  0xbf   : > { %301 = vrot.lane.b32.xlu2 %v293_v8, %s950_s25  ;;  %299 = vrot.lane.b32.xlu1 %v287_v3, %s950_s25  ;;  %s832_s25 = sshra.s32 %s493_s18, 4  ;;  %s833_s25 = int_to_ptr.hbm [resolvable:$true] %s832_s25 }
  0xc0   : > { %p839_p1 = scmp.lt.s32.totalorder %s833_s25, %s1205_s3 }
  0xc7   : > { %274 = vrot.lane.b32.xlu2 %v264_v6, %s951_s27 }
 0x119   : > { %v302_v13 = vpop.permute.xlu2 %301 }
 0x11a   : > { %v308_v14 = vsel %vm285_vm1, %v302_v13, 0.0 }
 0x11b   : > { %322 = vst.msk [vmem:[#allocation2 + $0x18] sm:$0xf] %vm310_vm2, %v308_v14 }
 0x121   : > { %v275_v25 = vpop.permute.xlu2 %274 }
 0x122   : > { %v328_v15 = vld [vmem:[#allocation2 + $0x18] sm:$0xf] }
 0x123   : > { %421 = vrot.lane.b32.xlu2 %v328_v15, %s952_s28 }
 0x129   : > { %v266_v16 = vpop.permute.xlu1 %265 }
 0x12a   : > { %v267_v17 = vsel %vm261_vm0, %v266_v16, %v263_v5 }
 0x12b   : > { %276 = vrot.lane.b32.xlu0 %v267_v17, %s951_s27  ;;  %342 = vrot.lane.b32.xlu2 %v328_v15, %s953_s10  ;;  %s834_s27 = scalar_lea.hbm %s833_s25, 16 }
 0x12c   : > { %p835_p0 = scmp.ne.s32.totalorder %s833_s25, %s834_s27  ;;  %p840_p2 = scmp.lt.s32.totalorder %s838_s23, %s834_s27 }
 0x12e   : > { %p836_p9 = pnand %p835_p0, %p1044_p6  ;;  %p841_p3 = por %p840_p2, %p839_p1 }
 0x130   : > { %p837_p13 = pneg %p836_p9 }
 0x131   : > { %v300_v19 = vpop.permute.xlu1 %299 }
 0x132   : > { %v304_v20 = vsel %vm303_vm3, %v300_v19, %v302_v13  ;;  %p842_p4 = pnand %p841_p3, %p837_p13 }
 0x133   : > { %v307_v21 = vsel %vm284_vm4, %v304_v20, 0.0  ;;  %469 = vperm.xlu2 %756, %v461_v41  }
 0x134   : > { %321 = vst [vmem:[#allocation2 + $0x10] sm:$0xf] %v307_v21 }
 0x13b   : > { %v324_v22 = vld [vmem:[#allocation2 + $0x10] sm:$0xf] }
 0x13c   : > { %419 = vrot.lane.b32.xlu1 %v324_v22, %s952_s28  ;;  %605 = vmatpush.msk.msra.mxu1 %vm355_vm6, %v324_v22 }
 0x144   : > { %340 = vrot.lane.b32.xlu1 %v324_v22, %s953_s10 }
 0x14c   : > { %464 = vperm.xlu1 %755, %v460_v40  }
 0x17d   : > { %v422_v33 = vpop.permute.xlu2 %421 }
 0x185   : > { %v343_v36 = vpop.permute.xlu2 %342 }
 0x18d   : > { %v470_v3 = vpop.permute.xlu2 %469 }
 0x19d   : > { %v277_v26 = vpop.permute.xlu0 %276 }
 0x19e   : > { %v279_v27 = vsel %vm278_vm8, %v275_v25, %v277_v26  ;;  %v283_v28 = vsel %vm254_vm7, %v277_v26, 0.0 }
 0x19f   : > { %v282_v29 = vsel %vm253_vm9, %v279_v27, 0.0  ;;  %311 = vst.msk [vmem:[#allocation2 + $0x8] sm:$0xf] %vm310_vm2, %v283_v28 }
 0x1a0   : > { %309 = vst [vmem:[#allocation2] sm:$0xf] %v282_v29 }
 0x1a6   : > { %v327_v30 = vld [vmem:[#allocation2 + $0x8] sm:$0xff] }
 0x1a7   : > { %v323_v31 = vld [vmem:[#allocation2] sm:$0xff] }
 0x1a8   : > { %404 = vmatpush.msra.mxu1 %v323_v31  ;;  %v745_v32 = vpack.i.bf16 %v327_v30, %v323_v31 }
 0x1a9   : > { %606 = vmatmul.msk.f32.vlgmr.msra.gmra.mxu1 %vm348_vm12, %v325_v39 }
 0x1aa   : > { %746 = vrot.lane.b32.xlu0 %v745_v32, %s952_s28 }
 0x1ae   : > { %v420_v34 = vpop.permute.xlu1 %419 }
 0x1af   : > { %v425_v35 = vsel %vm423_vm10, %v420_v34, %v422_v33 }
 0x1b0   : > { %608 = vmatpush.msk.msra.mxu2 %vm355_vm6, %v425_v35 }
 0x1b1   : > { %607 = vmatmul.msk.f32.gmra.mxu1 %vm348_vm12, %v326_v42 }
 0x1b2   : > { %751 = vrot.lane.b32.xlu0 %v745_v32, %s953_s10 }
 0x1b6   : > { %v341_v37 = vpop.permute.xlu1 %340 }
 0x1b7   : > { %v346_v38 = vsel %vm344_vm11, %v341_v37, %v343_v36 }
 0x1b8   : > { %602 = vmatpush.msk.msra.mxu0 %vm355_vm6, %v346_v38  ;;  %616 = vmatpush.msk.msra.mxu3 %vm355_vm6, %v346_v38 }
 0x1be   : > { %v465_v60 = vpop.permute.xlu1 %464 }
 0x21c   : > { %v747_v44 = vpop.permute.xlu0 %746 }
 0x21d   : > { %v749_v45 = vunpack.i.h.bf16 %v747_v44  ;;  %v748_v46 = vunpack.i.l.bf16 %v747_v44 }
 0x21f   : > { %v424_v48 = vsel %vm423_vm10, %v748_v46, %v749_v45 }
 0x220   : > { %450 = vmatpush.msra.mxu2 %v424_v48 }
 0x221   : > { %609 = vmatmul.msk.f32.vlgmr.msra.gmra.mxu2 %vm348_vm12, %v413_v47 }
 0x224   : > { %v752_v49 = vpop.permute.xlu0 %751 }
 0x225   : > { %v754_v50 = vunpack.i.h.bf16 %v752_v49  ;;  %v753_v51 = vunpack.i.l.bf16 %v752_v49 }
 0x226   : > { %v406_v56 = vpop.f32.mrf.mxu1 }
 0x227   : > { %v345_v54 = vsel %vm344_vm11, %v753_v51, %v754_v50 }
 0x228   : > { %373 = vmatpush.msra.mxu0 %v345_v54  ;;  %617 = vmatpush.msra.mxu3 %v345_v54 }
 0x229   : > { %603 = vmatmul.msk.f32.vlgmr.msra.gmra.mxu0 %vm348_vm12, %v330_v52  ;;  %604 = vmatmul.msk.f32.vlgmr.msra.gmra.mxu3 %vm348_vm12, %v331_v53 }
 0x22a   : > { %610 = vmatmul.msk.f32.gmra.mxu2 %vm348_vm12, %v414_v55 }
 0x22e   : > { %v409_v62 = vpop.f32.mrf.mxu1 }
 0x2a4   : > { %v452_v57 = vpop.f32.mrf.mxu2 }
 0x2a6   : > { %v375_v58 = vpop.f32.mrf.mxu0 }
 0x2a7   : > { %v407_v59 = vadd.f32 %v406_v56, %v375_v58 }
 0x2a9   : > { %v458_v61 = vadd.f32 %v452_v57, %v407_v59 }
 0x2ab   : > { %v472_v63 = vadd.f32 %v465_v60, %v458_v61 }
 0x2ac   : > { %v378_v0 = vpop.f32.mrf.mxu3 }
 0x2ad   : > { %474 = vst [vmem:[%s219_s20] sm:$0xff] %v472_v63  ;;  %v410_v1 = vadd.f32 %v409_v62, %v378_v0  ;;  %v455_v2 = vpop.f32.mrf.mxu2 }
 0x2af   : > { %v459_v4 = vadd.f32 %v455_v2, %v410_v1 }
 0x2b1   : > { %v473_v5 = vadd.f32 %v470_v3, %v459_v4 }
 0x2b3   : > { %475 = vst [vmem:[%s219_s20 + $0x8] sm:$0xff] %v473_v5 }
 0x2b4   : > { %845 = shalt.err (!%p842_p4)
}
 0x2b5   : > { %s955_s5 = smov 128   ;;  %s956_s6 = smov 256  }
 0x2b6   : > { %s957_s7 = smov 8  }
 0x2b7   : > { %627 = dma.vmem_to_hbm [thread:$0]  (%p1044_p6), %s491_s22, 256, %s493_s18, %s477_s19, %s955_s5, %s956_s6, %s957_s7  }
 0x2b8 PF: > { %s1231_s11 = sld [smem:[#allocation14_spill]] }
 0x2b9   : > { %s1232_s24 = sld [smem:[#allocation12_spill]] }
 0x2be   : > { %p644_p5 = scmp.ge.s32.totalorder %s1231_s11, 2 }
 0x2bf   : > { %s507_s9 = sand.u32 1, %s1232_s24  }
 0x2c0   : > { %p638_p7 = pnand %p644_p5, %p1049_p8  ;;  %s508_s1 = scalar_lea.sflag [#allocation5], %s507_s9 }
 0x2c2   : > { %p639_p10 = pneg %p638_p7 }
 0x2c4   : > { %899 = dma.done.wait (%p639_p10), %s508_s1, 256  }
 0x2c5   : > { %901 = vsyncadd (%p639_p10), %s508_s1, 4294967040  ;;  %s20_s22 = sadd.s32 1, %s1231_s11   ;;  %s1234_s20 = smov %s1095_s15 }
 0x2c6   : > { %p17_p11 = scmp.ge.s32.totalorder %s20_s22, 6   ;;  %s1235_s18 = sld [smem:[#allocation13_spill]] }
 0x2c7   : > { %s1236_s26 = sld [smem:[#allocation17_spill]]  ;;  %s1238_s12 = smov %s908_s13 }
 0x2c8   : > { %s1237_s25 = sld [smem:[#allocation18_spill]]  ;;  %s1239_s13 = smov %s912_s14 }
 0x2c9   : > { %s1240_s14 = smov %s1098_s8  ;;  %s1241_s15 = smov %s920_s16 }
 0x2ca   : > { %s1242_s16 = smov %s924_s17  ;;  %s1243_s17 = smov %s1234_s20 }
 0x2cb   : > { %s1244_s19 = smov %s940_s21  ;;  %19 = sbr.rel (!%p17_p11) target bundleno = 12 (0xc), region = 85 }
 0x2cd   : > { %s1245_s20 = smov %s1236_s26 }
 0x2ce   : > { %s1246_s21 = smov %s1237_s25 }
 0x2d0   :  { %514 = vsyncpa [#allocation4], 1 }
 0x2d1   :  { %516 = vsyncpa [#allocation4 + $0x1], 1 }
 0x2d2   :  { %517 = vsyncpa [#allocation7], 1 }
 0x2d3   :  { %518 = vsyncpa [#allocation5], 1 }
 0x2d4   :  { %520 = vsyncpa [#allocation5 + $0x1], 1 }

</bundles_post_ra>
